<compile_context>
chip_gen: v6e
topology: v6e:2x2x1
jax: 0.10.0
libtpu: 0.0.40
codegen_flags: <defaults>
</compile_context>

<pallas_src>
import jax
import jax.numpy as jnp
import numpy as np
from jax.experimental import pallas as pl
from jax.experimental.pallas import tpu as pltpu


# ----------------------------- Pallas kernel -----------------------------

def _outconv_kernel(x_ref, w_ref, b_ref, o_ref):
    """One grid step = one (batch, M-tile): o = W @ X_tile + b (lane-dense on M)."""
    x = x_ref[0]                                              # (Cin, TILE_M)
    w = w_ref[...]                                            # (Cout, Cin)
    acc = jnp.dot(w, x, preferred_element_type=jnp.float32)   # (Cout, TILE_M) f32
    acc = acc + b_ref[...]                                    # bias (Cout,1) f32, lane bcast
    o_ref[0] = acc.astype(o_ref.dtype)


# ------------------------------- wrapper ----------------------------------

def _pick_tile_m(M, N, Cin, Cout, in_bytes, out_bytes):
    """Largest multiple of 128 fitting a ~24 MiB double-buffer budget, <= ceil128(M),
    halved if needed so the grid keeps >= 2 steps (v7x megacore)."""
    budget = 24 * 1024 * 1024
    per_col = 2 * (Cin * in_bytes + Cout * out_bytes)        # double-buffered X + out
    t = min(8192, budget // per_col)
    m_ceil128 = ((M + 127) // 128) * 128
    t = min(t, m_ceil128)
    t = max((t // 128) * 128, 128)
    while t > 128 and N * ((M + t - 1) // t) < 2:
        t = max(((t // 2) // 128) * 128, 128)
    return t


def outconv_pallas(x_ncdhw, weight, bias, *, tile_m=None, vmem_limit_bytes=None):
    """x: (N, Cin, D, H, W); weight: (Cout, Cin, 1, 1, 1); bias: (Cout,)."""
    N, Cin, D, H, W = x_ncdhw.shape
    Cout = weight.shape[0]
    M = D * H * W

    # Flatten spatial dims (free reshape on contiguous NCDHW). No padding.
    x = x_ncdhw.reshape(N, Cin, M)
    out_dtype = x.dtype
    w2d = weight.reshape(Cout, Cin).astype(x.dtype)
    b2d = bias.reshape(Cout, 1).astype(jnp.float32)           # bias add kept in f32

    in_bytes = x.dtype.itemsize
    out_bytes = jnp.dtype(out_dtype).itemsize

    if tile_m is None:
        tile_m = _pick_tile_m(M, N, Cin, Cout, in_bytes, out_bytes)

    grid = (N, pl.cdiv(M, tile_m))

    if vmem_limit_bytes is None:
        need = (2 * tile_m * (Cin * in_bytes + Cout * out_bytes)
                + Cout * Cin * in_bytes + Cout * 4)
        vmem_limit_bytes = int(min(max(2 * need, 16 * 1024 * 1024), 48 * 1024 * 1024))

    cost = pl.CostEstimate(
        flops=2 * N * Cout * Cin * M,
        transcendentals=0,
        bytes_accessed=(N * Cin * M * in_bytes + N * Cout * M * out_bytes
                        + Cout * Cin * in_bytes + Cout * 4),
    )

    out = pl.pallas_call(
        _outconv_kernel,
        out_shape=jax.ShapeDtypeStruct((N, Cout, M), out_dtype),
        grid_spec=pltpu.PrefetchScalarGridSpec(
            num_scalar_prefetch=0,
            grid=grid,
            in_specs=[
                pl.BlockSpec((1, Cin, tile_m), lambda n, m: (n, 0, m)),  # X tile
                pl.BlockSpec((Cout, Cin), lambda n, m: (0, 0)),          # W (resident)
                pl.BlockSpec((Cout, 1), lambda n, m: (0, 0)),            # bias (resident)
            ],
            out_specs=pl.BlockSpec((1, Cout, tile_m), lambda n, m: (n, 0, m)),
        ),
        compiler_params=pltpu.CompilerParams(
            dimension_semantics=("parallel", "parallel"),
            vmem_limit_bytes=vmem_limit_bytes,
        ),
        cost_estimate=cost,
    )(x, w2d, b2d)

    return out.reshape(N, Cout, D, H, W)


# --------------------------- pure-JAX reference ---------------------------

def ref_outconv(x, w, b):
    out = jax.lax.conv_general_dilated(
        x, w, window_strides=(1, 1, 1), padding=[(0, 0)] * 3,
        dimension_numbers=("NCDHW", "OIDHW", "NCDHW"))
    return out + b[None, :, None, None, None]


# ---------------------------------- main ----------------------------------

if __name__ == "__main__":
    key = jax.random.PRNGKey(0)
    k1, k2, k3 = jax.random.split(key, 3)

    N = 2
    in_channels = 4
    out_channels = 4
    D = H = W = 16

    x = jax.random.normal(k1, (N, in_channels, D, H, W), jnp.float32)
    weight = 0.1 * jax.random.normal(
        k2, (out_channels, in_channels, 1, 1, 1), jnp.float32)
    bias = 0.1 * jax.random.normal(k3, (out_channels,), jnp.float32)

    out = jax.jit(outconv_pallas)(x, weight, bias)
    out = jax.block_until_ready(out)

    ref = jax.block_until_ready(ref_outconv(x, weight, bias))
    assert out.shape == (N, out_channels, D, H, W), out.shape
    np.testing.assert_allclose(np.asarray(out), np.asarray(ref), rtol=1e-5, atol=1e-5)

    print("KERNEL_OK")
</pallas_src>

<mosaic_0001>
module attributes {stable_mosaic.version = 11 : i64} {
  func.func @_outconv_kernel(%arg0: i32, %arg1: i32, %arg2: memref<1x4x4096xf32, #tpu.memory_space<vmem>>, %arg3: memref<4x4xf32, #tpu.memory_space<vmem>>, %arg4: memref<4x1xf32, #tpu.memory_space<vmem>>, %arg5: memref<1x4x4096xf32, #tpu.memory_space<vmem>>) attributes {dimension_semantics = [#tpu.dimension_semantics<parallel>, #tpu.dimension_semantics<parallel>], iteration_bounds = array<i64: 2, 1>, scalar_prefetch = 0 : i64, scratch_operands = 0 : i64, tpu.core_type = #tpu.core_type<tc>, window_params = [{transform_indices = @transform_0, window_bounds = array<i64: 1, 4, 4096>}, {pipeline_mode = #tpu.pipeline_mode<synchronous>, transform_indices = @transform_1, window_bounds = array<i64: 4, 4>}, {pipeline_mode = #tpu.pipeline_mode<synchronous>, transform_indices = @transform_2, window_bounds = array<i64: 4, 1>}, {transform_indices = @transform_3, window_bounds = array<i64: 1, 4, 4096>}]} {
    %c0 = arith.constant 0 : index
    %c0_0 = arith.constant 0 : index
    %c0_1 = arith.constant 0 : index
    %0 = vector.load %arg2[%c0, %c0_0, %c0_1] : memref<1x4x4096xf32, #tpu.memory_space<vmem>>, vector<1x4x4096xf32>
    %1 = vector.shape_cast %0 : vector<1x4x4096xf32> to vector<4x4096xf32>
    %c0_2 = arith.constant 0 : index
    %c0_3 = arith.constant 0 : index
    %2 = vector.load %arg3[%c0_2, %c0_3] : memref<4x4xf32, #tpu.memory_space<vmem>>, vector<4x4xf32>
    %cst = arith.constant dense<0.000000e+00> : vector<4x4096xf32>
    %3 = tpu.matmul %2, %1, %cst {dimension_numbers = #tpu.dot_dimension_numbers<[1], [0], [0], [1], [0, 0, 1, 1], [], []>} : vector<4x4xf32>, vector<4x4096xf32>, vector<4x4096xf32> -> vector<4x4096xf32>
    %c0_4 = arith.constant 0 : index
    %c0_5 = arith.constant 0 : index
    %4 = vector.load %arg4[%c0_4, %c0_5] : memref<4x1xf32, #tpu.memory_space<vmem>>, vector<4x1xf32>
    %5 = vector.broadcast %4 : vector<4x1xf32> to vector<4x4096xf32>
    %6 = arith.addf %3, %5 : vector<4x4096xf32>
    %c0_6 = arith.constant 0 : index
    %c0_7 = arith.constant 0 : index
    %c0_8 = arith.constant 0 : index
    %7 = vector.load %arg5[%c0_6, %c0_7, %c0_8] : memref<1x4x4096xf32, #tpu.memory_space<vmem>>, vector<1x4x4096xf32>
    %8 = vector.shape_cast %7 : vector<1x4x4096xf32> to vector<4x4096xf32>
    %9 = vector.shape_cast %6 : vector<4x4096xf32> to vector<1x4x4096xf32>
    tpu.vector_store %arg5[%c0_6, %c0_7, %c0_8], %9 {strides = array<i32>} : memref<1x4x4096xf32, #tpu.memory_space<vmem>>, vector<1x4x4096xf32>,
    return
  }
  func.func @transform_0(%arg0: i32, %arg1: i32) -> (i32, i32, i32) {
    %c0_i32 = arith.constant 0 : i32
    %c0_i32_0 = arith.constant 0 : i32
    return %arg0, %c0_i32, %arg1 : i32, i32, i32
  }
  func.func @transform_1(%arg0: i32, %arg1: i32) -> (i32, i32) {
    %c0_i32 = arith.constant 0 : i32
    %c0_i32_0 = arith.constant 0 : i32
    %c0_i32_1 = arith.constant 0 : i32
    return %c0_i32, %c0_i32_0 : i32, i32
  }
  func.func @transform_2(%arg0: i32, %arg1: i32) -> (i32, i32) {
    %c0_i32 = arith.constant 0 : i32
    %c0_i32_0 = arith.constant 0 : i32
    %c0_i32_1 = arith.constant 0 : i32
    return %c0_i32, %c0_i32_0 : i32, i32
  }
  func.func @transform_3(%arg0: i32, %arg1: i32) -> (i32, i32, i32) {
    %c0_i32 = arith.constant 0 : i32
    %c0_i32_0 = arith.constant 0 : i32
    return %arg0, %c0_i32, %arg1 : i32, i32, i32
  }
}

</mosaic_0001>

<bundles_post_ra>
// kernel: outconv_pallas.1
= control target key start
LH: loop header
LB: loop body
LE: loop exit
PB: predicated region body
PF: predicated region fallthrough
CT: control target
= control target key end

     0   :  { %s1787_s12 = smov 0   ;;  %s1789_s13 = smov 0   ;;  %s1985_s0 = inlined_call_operand.vmem [shape: f32[2,4,4096], index: 0, kind: input, shape index: {}]   ;;  %s1986_s1 = inlined_call_operand.vmem [shape: f32[4,4], index: 1, kind: input, shape index: {}]   ;;  %s1987_s2 = inlined_call_operand.vmem [shape: f32[4,1], index: 2, kind: input, shape index: {}]   ;;  %s1988_s3 = inlined_call_operand.vmem [shape: f32[2,4,4096], index: 3, kind: output, shape index: {}]  }
   0x1   :  { %s1791_s14 = smov 0  }
   0x2 LB: > { %s25_s15 = sadd.s32 1, %s1759_s13  ;;  %p1641_p0 = scmp.ge.s32.totalorder %s1763_s14, 1  ;;  %s1763_s14 = sphi %s1791_s14, %s13_s14   ;;  %s1759_s13 = sphi %s1789_s13, %s1990_s13   ;;  %s1755_s12 = sphi %s1787_s12, %s1989_s12  }
   0x3   : > { %p27_p1 = scmp.ge.s32.totalorder %s25_s15, 2  ;;  %p158_p2 = scmp.lt.s32.totalorder %s1763_s14, 3 }
   0x5   : > { %s1992_s15 = smov (%p27_p1, %s25_s15), 0  ;;  %p159_p3 = pnand %p1641_p0, %p158_p2 }
   0x6   : > { %p191_p4 = scmp.lt.s32.totalorder (!%p159_p3), %s1755_s12, 1 }
   0x7   : > { %162 = sbr.rel (%p159_p3) target bundleno = 248 (0xf8), region = 32 }
   0xc   : > { %v1765_v0 = vmov 0.0   ;;  %v227_v1 = vld [vmem:[%s1987_s2] sm:$0xf]  ;;  %s1994_s12 = smov (!%p191_p4, %s1755_s12), 1  ;;  %v1766_v2 = vmov 0   ;;  %vm269_vm0 = vcmask 1043456  }
   0xd   : > { %398 = vmatprep.mubr.f32.mxu0 %v1765_v0  ;;  %469 = vmatprep.mubr.f32.mxu1 %v1765_v0  ;;  %s1696_s18 = sshll.u32 %s1994_s12, 7  ;;  %v1827_v9 = vld [vmem:[%s1986_s1] sm:$0xf]  ;;  %vm265_vm1 = vcmask 31744  }
   0xe   : > { %1724 = vset.pattern.permute.xlu0 %v1766_v2  ;;  %s1818_s21 = scalar_lea.vmem %s1985_s0, %s1696_s18  ;;  %s1930_s26 = scalar_lea.vmem %s1988_s3, %s1696_s18 }
   0xf   : > { %230 = vperm.xlu0 %1724, %v227_v1   ;;  %v210_v3 = vld [vmem:[%s1818_s21] sm:$0xff]  ;;  %v211_v4 = vld [vmem:[%s1818_s21 + $0x8] sm:$0xff]  ;;  %v212_v5 = vld [vmem:[%s1818_s21 + $0x10] sm:$0xff] }
  0x10   : > { %v249_v6 = vcombine.high %v210_v3, %v210_v3  ;;  %v250_v7 = vcombine.high %v211_v4, %v211_v4  ;;  %v213_v8 = vld [vmem:[%s1818_s21 + $0x18] sm:$0xff]  ;;  %v251_v10 = vcombine.high %v212_v5, %v212_v5  ;;  %v214_v12 = vld [vmem:[%s1818_s21 + $0x20] sm:$0xff]  ;;  %v215_v13 = vld [vmem:[%s1818_s21 + $0x28] sm:$0xff] }
  0x11   : > { %v252_v11 = vcombine.high %v213_v8, %v213_v8  ;;  %v253_v14 = vcombine.high %v214_v12, %v214_v12  ;;  %v254_v15 = vcombine.high %v215_v13, %v215_v13  ;;  %v216_v16 = vld [vmem:[%s1818_s21 + $0x30] sm:$0xff]  ;;  %v217_v17 = vld [vmem:[%s1818_s21 + $0x38] sm:$0xff]  ;;  %v218_v20 = vld [vmem:[%s1818_s21 + $0x40] sm:$0xff] }
  0x12   : > { %1646 = vmatprep.subr.msk.mxu0 %vm269_vm0, %v249_v6  ;;  %1649 = vmatprep.subr.msk.mxu1 %vm269_vm0, %v250_v7  ;;  %v255_v18 = vcombine.high %v216_v16, %v216_v16  ;;  %v256_v19 = vcombine.high %v217_v17, %v217_v17  ;;  %v219_v21 = vld [vmem:[%s1818_s21 + $0x48] sm:$0xff]  ;;  %v257_v22 = vcombine.high %v218_v20, %v218_v20  ;;  %v220_v24 = vld [vmem:[%s1818_s21 + $0x50] sm:$0xff]  ;;  %v221_v25 = vld [vmem:[%s1818_s21 + $0x58] sm:$0xff] }
  0x13   : > { %1647 = vmatpush1.msk.msra.mxu0 %vm269_vm0, %v210_v3  ;;  %1650 = vmatpush1.msk.msra.mxu1 %vm269_vm0, %v211_v4  ;;  %v258_v23 = vcombine.high %v219_v21, %v219_v21  ;;  %v259_v26 = vcombine.high %v220_v24, %v220_v24  ;;  %v260_v27 = vcombine.high %v221_v25, %v221_v25  ;;  %v222_v28 = vld [vmem:[%s1818_s21 + $0x60] sm:$0xff]  ;;  %v223_v29 = vld [vmem:[%s1818_s21 + $0x68] sm:$0xff]  ;;  %v224_v32 = vld [vmem:[%s1818_s21 + $0x70] sm:$0xff] }
  0x14   : > { %1648 = vmatmul.mubr.msk.f32.vlgmr.msra.gmra.mxu0 %vm265_vm1, %v1827_v9  ;;  %1651 = vmatmul.mubr.msk.f32.vlgmr.msra.gmra.mxu1 %vm265_vm1, %v1827_v9  ;;  %v261_v30 = vcombine.high %v222_v28, %v222_v28  ;;  %v262_v31 = vcombine.high %v223_v29, %v223_v29  ;;  %v225_v33 = vld [vmem:[%s1818_s21 + $0x78] sm:$0xff]  ;;  %v263_v34 = vcombine.high %v224_v32, %v224_v32 }
  0x15   : > { %1652 = vmatprep.subr.msk.mxu0 %vm269_vm0, %v251_v10  ;;  %1655 = vmatprep.subr.msk.mxu1 %vm269_vm0, %v252_v11  ;;  %v264_v35 = vcombine.high %v225_v33, %v225_v33 }
  0x16   : > { %1653 = vmatpush1.msk.msra.mxu0 %vm269_vm0, %v212_v5  ;;  %1656 = vmatpush1.msk.msra.mxu1 %vm269_vm0, %v213_v8 }
  0x17   : > { %540 = vmatprep.mubr.f32.mxu0 %v1765_v0  ;;  %611 = vmatprep.mubr.f32.mxu1 %v1765_v0 }
  0x18   : > { %1654 = vmatmul.mubr.msk.f32.vlgmr.msra.gmra.mxu0 %vm265_vm1, %v1827_v9  ;;  %1657 = vmatmul.mubr.msk.f32.vlgmr.msra.gmra.mxu1 %vm265_vm1, %v1827_v9 }
  0x19   : > { %1658 = vmatprep.subr.msk.mxu0 %vm269_vm0, %v253_v14  ;;  %1661 = vmatprep.subr.msk.mxu1 %vm269_vm0, %v254_v15 }
  0x1a   : > { %1659 = vmatpush1.msk.msra.mxu0 %vm269_vm0, %v214_v12  ;;  %1662 = vmatpush1.msk.msra.mxu1 %vm269_vm0, %v215_v13 }
  0x1b   : > { %682 = vmatprep.mubr.f32.mxu0 %v1765_v0  ;;  %753 = vmatprep.mubr.f32.mxu1 %v1765_v0 }
  0x1c   : > { %1660 = vmatmul.mubr.msk.f32.vlgmr.msra.gmra.mxu0 %vm265_vm1, %v1827_v9  ;;  %1663 = vmatmul.mubr.msk.f32.vlgmr.msra.gmra.mxu1 %vm265_vm1, %v1827_v9 }
  0x1d   : > { %1664 = vmatprep.subr.msk.mxu0 %vm269_vm0, %v255_v18  ;;  %1667 = vmatprep.subr.msk.mxu1 %vm269_vm0, %v256_v19 }
  0x1e   : > { %1665 = vmatpush1.msk.msra.mxu0 %vm269_vm0, %v216_v16  ;;  %1668 = vmatpush1.msk.msra.mxu1 %vm269_vm0, %v217_v17 }
  0x1f   : > { %824 = vmatprep.mubr.f32.mxu0 %v1765_v0  ;;  %895 = vmatprep.mubr.f32.mxu1 %v1765_v0 }
  0x20   : > { %1666 = vmatmul.mubr.msk.f32.vlgmr.msra.gmra.mxu0 %vm265_vm1, %v1827_v9  ;;  %1669 = vmatmul.mubr.msk.f32.vlgmr.msra.gmra.mxu1 %vm265_vm1, %v1827_v9 }
  0x21   : > { %1670 = vmatprep.subr.msk.mxu0 %vm269_vm0, %v257_v22  ;;  %1673 = vmatprep.subr.msk.mxu1 %vm269_vm0, %v258_v23 }
  0x22   : > { %1671 = vmatpush1.msk.msra.mxu0 %vm269_vm0, %v218_v20  ;;  %1674 = vmatpush1.msk.msra.mxu1 %vm269_vm0, %v219_v21 }
  0x23   : > { %966 = vmatprep.mubr.f32.mxu0 %v1765_v0  ;;  %1037 = vmatprep.mubr.f32.mxu1 %v1765_v0 }
  0x24   : > { %1672 = vmatmul.mubr.msk.f32.vlgmr.msra.gmra.mxu0 %vm265_vm1, %v1827_v9  ;;  %1675 = vmatmul.mubr.msk.f32.vlgmr.msra.gmra.mxu1 %vm265_vm1, %v1827_v9 }
  0x25   : > { %1676 = vmatprep.subr.msk.mxu0 %vm269_vm0, %v259_v26  ;;  %1679 = vmatprep.subr.msk.mxu1 %vm269_vm0, %v260_v27 }
  0x26   : > { %1677 = vmatpush1.msk.msra.mxu0 %vm269_vm0, %v220_v24  ;;  %1680 = vmatpush1.msk.msra.mxu1 %vm269_vm0, %v221_v25 }
  0x27   : > { %1108 = vmatprep.mubr.f32.mxu0 %v1765_v0  ;;  %1179 = vmatprep.mubr.f32.mxu1 %v1765_v0 }
  0x28   : > { %1678 = vmatmul.mubr.msk.f32.vlgmr.msra.gmra.mxu0 %vm265_vm1, %v1827_v9  ;;  %1681 = vmatmul.mubr.msk.f32.vlgmr.msra.gmra.mxu1 %vm265_vm1, %v1827_v9 }
  0x29   : > { %1682 = vmatprep.subr.msk.mxu0 %vm269_vm0, %v261_v30  ;;  %1685 = vmatprep.subr.msk.mxu1 %vm269_vm0, %v262_v31 }
  0x2a   : > { %1683 = vmatpush1.msk.msra.mxu0 %vm269_vm0, %v222_v28  ;;  %1686 = vmatpush1.msk.msra.mxu1 %vm269_vm0, %v223_v29 }
  0x2b   : > { %1250 = vmatprep.mubr.f32.mxu0 %v1765_v0  ;;  %1321 = vmatprep.mubr.f32.mxu1 %v1765_v0 }
  0x2c   : > { %1684 = vmatmul.mubr.msk.f32.vlgmr.msra.gmra.mxu0 %vm265_vm1, %v1827_v9  ;;  %1687 = vmatmul.mubr.msk.f32.vlgmr.msra.gmra.mxu1 %vm265_vm1, %v1827_v9 }
  0x2d   : > { %1688 = vmatprep.subr.msk.mxu0 %vm269_vm0, %v263_v34  ;;  %1691 = vmatprep.subr.msk.mxu1 %vm269_vm0, %v264_v35 }
  0x2e   : > { %1689 = vmatpush1.msk.msra.mxu0 %vm269_vm0, %v224_v32  ;;  %1692 = vmatpush1.msk.msra.mxu1 %vm269_vm0, %v225_v33 }
  0x2f   : > { %1392 = vmatprep.mubr.f32.mxu0 %v1765_v0  ;;  %1463 = vmatprep.mubr.f32.mxu1 %v1765_v0 }
  0x30   : > { %1690 = vmatmul.mubr.msk.f32.vlgmr.msra.gmra.mxu0 %vm265_vm1, %v1827_v9  ;;  %1693 = vmatmul.mubr.msk.f32.vlgmr.msra.gmra.mxu1 %vm265_vm1, %v1827_v9 }
  0x8a   : > { %v1919_v36 = vpop.permute.xlu0 %230 }
  0xd4   : > { %v400_v37 = vpop.f32.mrf.mxu0  ;;  %v471_v38 = vpop.f32.mrf.mxu1 }
  0xd5   : > { %v401_v41 = vadd.f32 %v400_v37, %v1919_v36  ;;  %v472_v43 = vadd.f32 %v471_v38, %v1919_v36 }
  0xd6   : > { %v402_v39 = vpop.f32.mrf.mxu0  ;;  %v473_v40 = vpop.f32.mrf.mxu1 }
  0xd7   : > { %v403_v42 = vadd.f32 %v402_v39, %v1919_v36  ;;  %v474_v44 = vadd.f32 %v473_v40, %v1919_v36 }
  0xd8   : > { %v542_v45 = vpop.f32.mrf.mxu0  ;;  %v613_v46 = vpop.f32.mrf.mxu1 }
  0xd9   : > { %v1502_v47 = vcombine.low %v401_v41, %v403_v42  ;;  %v1503_v48 = vcombine.low %v472_v43, %v474_v44  ;;  %v543_v51 = vadd.f32 %v542_v45, %v1919_v36  ;;  %v614_v52 = vadd.f32 %v613_v46, %v1919_v36 }
  0xda   : > { %v544_v49 = vpop.f32.mrf.mxu0  ;;  %v615_v50 = vpop.f32.mrf.mxu1 }
  0xdb   : > { %1534 = vst [vmem:[%s1930_s26] sm:$0xff] %v1502_v47  ;;  %1535 = vst [vmem:[%s1930_s26 + $0x8] sm:$0xff] %v1503_v48  ;;  %v545_v53 = vadd.f32 %v544_v49, %v1919_v36  ;;  %v616_v54 = vadd.f32 %v615_v50, %v1919_v36 }
  0xdc   : > { %v684_v55 = vpop.f32.mrf.mxu0  ;;  %v755_v56 = vpop.f32.mrf.mxu1 }
  0xdd   : > { %v1504_v57 = vcombine.low %v543_v51, %v545_v53  ;;  %v1505_v58 = vcombine.low %v614_v52, %v616_v54  ;;  %v685_v61 = vadd.f32 %v684_v55, %v1919_v36  ;;  %v756_v62 = vadd.f32 %v755_v56, %v1919_v36 }
  0xde   : > { %v686_v59 = vpop.f32.mrf.mxu0  ;;  %v757_v60 = vpop.f32.mrf.mxu1 }
  0xdf   : > { %1536 = vst [vmem:[%s1930_s26 + $0x10] sm:$0xff] %v1504_v57  ;;  %1537 = vst [vmem:[%s1930_s26 + $0x18] sm:$0xff] %v1505_v58  ;;  %v687_v63 = vadd.f32 %v686_v59, %v1919_v36  ;;  %v758_v0 = vadd.f32 %v757_v60, %v1919_v36 }
  0xe0   : > { %v826_v1 = vpop.f32.mrf.mxu0  ;;  %v897_v2 = vpop.f32.mrf.mxu1 }
  0xe1   : > { %v1506_v3 = vcombine.low %v685_v61, %v687_v63  ;;  %v1507_v4 = vcombine.low %v756_v62, %v758_v0  ;;  %v827_v7 = vadd.f32 %v826_v1, %v1919_v36  ;;  %v898_v8 = vadd.f32 %v897_v2, %v1919_v36 }
  0xe2   : > { %v828_v5 = vpop.f32.mrf.mxu0  ;;  %v899_v6 = vpop.f32.mrf.mxu1 }
  0xe3   : > { %1538 = vst [vmem:[%s1930_s26 + $0x20] sm:$0xff] %v1506_v3  ;;  %1539 = vst [vmem:[%s1930_s26 + $0x28] sm:$0xff] %v1507_v4  ;;  %v829_v9 = vadd.f32 %v828_v5, %v1919_v36  ;;  %v900_v10 = vadd.f32 %v899_v6, %v1919_v36 }
  0xe4   : > { %v968_v11 = vpop.f32.mrf.mxu0  ;;  %v1039_v12 = vpop.f32.mrf.mxu1 }
  0xe5   : > { %v1508_v13 = vcombine.low %v827_v7, %v829_v9  ;;  %v1509_v14 = vcombine.low %v898_v8, %v900_v10  ;;  %v969_v17 = vadd.f32 %v968_v11, %v1919_v36  ;;  %v1040_v18 = vadd.f32 %v1039_v12, %v1919_v36 }
  0xe6   : > { %v970_v15 = vpop.f32.mrf.mxu0  ;;  %v1041_v16 = vpop.f32.mrf.mxu1 }
  0xe7   : > { %1540 = vst [vmem:[%s1930_s26 + $0x30] sm:$0xff] %v1508_v13  ;;  %1541 = vst [vmem:[%s1930_s26 + $0x38] sm:$0xff] %v1509_v14  ;;  %v971_v19 = vadd.f32 %v970_v15, %v1919_v36  ;;  %v1042_v20 = vadd.f32 %v1041_v16, %v1919_v36 }
  0xe8   : > { %v1110_v21 = vpop.f32.mrf.mxu0  ;;  %v1181_v22 = vpop.f32.mrf.mxu1 }
  0xe9   : > { %v1510_v23 = vcombine.low %v969_v17, %v971_v19  ;;  %v1511_v24 = vcombine.low %v1040_v18, %v1042_v20  ;;  %v1111_v27 = vadd.f32 %v1110_v21, %v1919_v36  ;;  %v1182_v28 = vadd.f32 %v1181_v22, %v1919_v36 }
  0xea   : > { %v1112_v25 = vpop.f32.mrf.mxu0  ;;  %v1183_v26 = vpop.f32.mrf.mxu1 }
  0xeb   : > { %1542 = vst [vmem:[%s1930_s26 + $0x40] sm:$0xff] %v1510_v23  ;;  %1543 = vst [vmem:[%s1930_s26 + $0x48] sm:$0xff] %v1511_v24  ;;  %v1113_v29 = vadd.f32 %v1112_v25, %v1919_v36  ;;  %v1184_v30 = vadd.f32 %v1183_v26, %v1919_v36 }
  0xec   : > { %v1252_v31 = vpop.f32.mrf.mxu0  ;;  %v1323_v32 = vpop.f32.mrf.mxu1 }
  0xed   : > { %v1512_v33 = vcombine.low %v1111_v27, %v1113_v29  ;;  %v1513_v34 = vcombine.low %v1182_v28, %v1184_v30  ;;  %v1253_v38 = vadd.f32 %v1252_v31, %v1919_v36  ;;  %v1324_v39 = vadd.f32 %v1323_v32, %v1919_v36 }
  0xee   : > { %v1254_v35 = vpop.f32.mrf.mxu0  ;;  %v1325_v37 = vpop.f32.mrf.mxu1 }
  0xef   : > { %1544 = vst [vmem:[%s1930_s26 + $0x50] sm:$0xff] %v1512_v33  ;;  %1545 = vst [vmem:[%s1930_s26 + $0x58] sm:$0xff] %v1513_v34  ;;  %v1255_v40 = vadd.f32 %v1254_v35, %v1919_v36  ;;  %v1326_v41 = vadd.f32 %v1325_v37, %v1919_v36 }
  0xf0   : > { %v1394_v42 = vpop.f32.mrf.mxu0  ;;  %v1465_v43 = vpop.f32.mrf.mxu1 }
  0xf1   : > { %v1514_v44 = vcombine.low %v1253_v38, %v1255_v40  ;;  %v1515_v45 = vcombine.low %v1324_v39, %v1326_v41  ;;  %v1395_v48 = vadd.f32 %v1394_v42, %v1919_v36  ;;  %v1466_v49 = vadd.f32 %v1465_v43, %v1919_v36 }
  0xf2   : > { %v1396_v46 = vpop.f32.mrf.mxu0  ;;  %v1467_v47 = vpop.f32.mrf.mxu1 }
  0xf3   : > { %1546 = vst [vmem:[%s1930_s26 + $0x60] sm:$0xff] %v1514_v44  ;;  %1547 = vst [vmem:[%s1930_s26 + $0x68] sm:$0xff] %v1515_v45  ;;  %v1397_v50 = vadd.f32 %v1396_v46, %v1919_v36  ;;  %v1468_v51 = vadd.f32 %v1467_v47, %v1919_v36 }
  0xf5   : > { %v1516_v52 = vcombine.low %v1395_v48, %v1397_v50  ;;  %v1517_v53 = vcombine.low %v1466_v49, %v1468_v51 }
  0xf7   : > { %1548 = vst [vmem:[%s1930_s26 + $0x70] sm:$0xff] %v1516_v52  ;;  %1549 = vst [vmem:[%s1930_s26 + $0x78] sm:$0xff] %v1517_v53 }
  0xf8 PF: > { %s13_s14 = sadd.s32 1, %s1763_s14   ;;  %s1989_s12 = smov %s1759_s13 }
  0xf9   : > { %p10_p5 = scmp.ge.s32.totalorder %s13_s14, 4   ;;  %s1990_s13 = smov %s1992_s15 }
  0xfb   :  { %12 = sbr.rel (!%p10_p5) target bundleno = 2 (0x2), region = 62 }

</bundles_post_ra>
